<compile_context>
chip_gen: v7x
topology: tpu7x:2x2x1
jax: 0.10.0
libtpu: 0.0.40
codegen_flags: <defaults>
</compile_context>

<pallas_src>
import jax
import jax.numpy as jnp
from jax.experimental import pallas as pl
from jax.experimental.pallas import tpu as pltpu

_EPS = 1e-5
_H_PAD = 128    # hidden 50 -> lane-dense 128
_C_PAD = 128    # classes 2 -> lane-dense 128 (sliced back in the wrapper)
_TB_MAX = 2048  # batch tile cap: 2 bufs * 2048*1000*4B ~= 16 MiB for x


def _round_up(n, m):
    return (n + m - 1) // m * m


def _post_alexnet_kernel(x_ref, w1_ref, w2_ref, w3_ref, bias_ref, o_ref):
    """One batch tile: 3 MXU matmuls + ReLU + sigmoid; BN already folded."""
    x = x_ref[...]                      # (TB, F_in)
    b1 = bias_ref[0:1, :]               # (1, 128) static slices -> zero cost
    b2 = bias_ref[1:2, :]
    b3 = bias_ref[2:3, :]

    # Linear(1000, 50) [+ folded BN] + ReLU
    h1 = jnp.dot(x, w1_ref[...], preferred_element_type=jnp.float32) + b1
    h1 = jnp.maximum(h1, 0.0)

    # Linear(50, 50) [+ folded BN] + ReLU
    h2 = jnp.dot(h1, w2_ref[...], preferred_element_type=jnp.float32) + b2
    h2 = jnp.maximum(h2, 0.0)

    # Linear(50, 2) + sigmoid (exp goes to the EUP slot)
    logits = jnp.dot(h2, w3_ref[...], preferred_element_type=jnp.float32) + b3
    o_ref[...] = jax.nn.sigmoid(logits).astype(o_ref.dtype)


@jax.jit
def post_alexnet_forward(x, params):
    """x: (B, alexnet_classes) f32. params: dict of weights (see init_params)."""
    B, F_in = x.shape
    H = params["w1"].shape[1]
    C = params["w3"].shape[1]

    # ---- fold eval-mode BatchNorm1d into weights / biases (plain-JAX prep) ----
    def fold(w, b, gamma, beta, mean, var):
        scale = gamma * jax.lax.rsqrt(var + _EPS)
        return w * scale[None, :], (b - mean) * scale + beta

    w1f, b1f = fold(params["w1"], params["b1"],
                    params["bn1_gamma"], params["bn1_beta"],
                    params["bn1_mean"], params["bn1_var"])
    w2f, b2f = fold(params["w2"], params["b2"],
                    params["bn2_gamma"], params["bn2_beta"],
                    params["bn2_mean"], params["bn2_var"])
    w3, b3 = params["w3"], params["b3"]

    # ---- zero-pad to lane-dense shapes (padded features stay exactly 0) ----
    w1p = jnp.zeros((F_in, _H_PAD), jnp.float32).at[:, :H].set(w1f)
    w2p = jnp.zeros((_H_PAD, _H_PAD), jnp.float32).at[:H, :H].set(w2f)
    w3p = jnp.zeros((_H_PAD, _C_PAD), jnp.float32).at[:H, :C].set(w3)
    biases = jnp.zeros((8, _H_PAD), jnp.float32)
    biases = biases.at[0, :H].set(b1f).at[1, :H].set(b2f).at[2, :C].set(b3)

    # ---- batch tiling ----
    TB = min(_round_up(B, 8), _TB_MAX)
    B_pad = _round_up(B, TB)
    x_p = x if B_pad == B else jnp.pad(x, ((0, B_pad - B), (0, 0)))
    num_tiles = B_pad // TB

    # VMEM budget: double-buffered x/out tiles + resident weights + slack.
    dtype_bytes = 4
    vmem_bytes = 2 * dtype_bytes * (
        TB * F_in + TB * _C_PAD
        + F_in * _H_PAD + _H_PAD * _H_PAD + _H_PAD * _C_PAD + 8 * _H_PAD
    ) + (4 << 20)
    vmem_bytes = max(int(vmem_bytes), 32 << 20)

    cost = pl.CostEstimate(
        flops=2 * B_pad * (F_in * _H_PAD + _H_PAD * _H_PAD + _H_PAD * _C_PAD),
        transcendentals=B_pad * _C_PAD,
        bytes_accessed=dtype_bytes * (
            B_pad * F_in + B_pad * _C_PAD
            + F_in * _H_PAD + 2 * _H_PAD * _H_PAD + 8 * _H_PAD),
    )

    out_p = pl.pallas_call(
        _post_alexnet_kernel,
        out_shape=jax.ShapeDtypeStruct((B_pad, _C_PAD), jnp.float32),
        grid=(num_tiles,),
        in_specs=[
            pl.BlockSpec((TB, F_in), lambda i: (i, 0)),          # x: tiled over batch
            pl.BlockSpec((F_in, _H_PAD), lambda i: (0, 0)),      # w1: resident
            pl.BlockSpec((_H_PAD, _H_PAD), lambda i: (0, 0)),    # w2: resident
            pl.BlockSpec((_H_PAD, _C_PAD), lambda i: (0, 0)),    # w3: resident
            pl.BlockSpec((8, _H_PAD), lambda i: (0, 0)),         # stacked biases
        ],
        out_specs=pl.BlockSpec((TB, _C_PAD), lambda i: (i, 0)),
        compiler_params=pltpu.CompilerParams(
            dimension_semantics=("parallel",),
            vmem_limit_bytes=vmem_bytes,
        ),
        cost_estimate=cost,
    )(x_p, w1p, w2p, w3p, biases)

    return out_p[:B, :C]


def init_params(key, alexnet_classes=1000, hidden=50, num_classes=2):
    """Deterministic PyTorch-Linear-style init (uniform +-1/sqrt(fan_in))."""
    ks = jax.random.split(key, 6)

    def linear(kw, kb, fan_in, fan_out):
        bound = 1.0 / jnp.sqrt(fan_in)
        w = jax.random.uniform(kw, (fan_in, fan_out), jnp.float32, -bound, bound)
        b = jax.random.uniform(kb, (fan_out,), jnp.float32, -bound, bound)
        return w, b

    w1, b1 = linear(ks[0], ks[1], alexnet_classes, hidden)
    w2, b2 = linear(ks[2], ks[3], hidden, hidden)
    w3, b3 = linear(ks[4], ks[5], hidden, num_classes)

    zeros = jnp.zeros((hidden,), jnp.float32)
    ones = jnp.ones((hidden,), jnp.float32)
    return {
        "w1": w1, "b1": b1,
        "bn1_gamma": ones, "bn1_beta": zeros, "bn1_mean": zeros, "bn1_var": ones,
        "w2": w2, "b2": b2,
        "bn2_gamma": ones, "bn2_beta": zeros, "bn2_mean": zeros, "bn2_var": ones,
        "w3": w3, "b3": b3,
    }


def _reference_forward(x, params):
    """Pure-JAX reference (eval-mode), for correctness check."""
    def bn(h, g, b, m, v):
        return (h - m) * jax.lax.rsqrt(v + _EPS) * g + b

    h = x @ params["w1"] + params["b1"]
    h = jnp.maximum(bn(h, params["bn1_gamma"], params["bn1_beta"],
                       params["bn1_mean"], params["bn1_var"]), 0.0)
    h = h @ params["w2"] + params["b2"]
    h = jnp.maximum(bn(h, params["bn2_gamma"], params["bn2_beta"],
                       params["bn2_mean"], params["bn2_var"]), 0.0)
    h = h @ params["w3"] + params["b3"]
    return jax.nn.sigmoid(h)


if __name__ == "__main__":
    key = jax.random.PRNGKey(0)
    k_param, k_x = jax.random.split(key)

    ALEXNET_CLASSES = 1000
    NUM_CLASSES = 2
    BATCH = 8

    params = init_params(k_param, ALEXNET_CLASSES, 50, NUM_CLASSES)
    x = jax.random.normal(k_x, (BATCH, ALEXNET_CLASSES), jnp.float32)

    out = post_alexnet_forward(x, params)
    out = jax.block_until_ready(out)

    ref = _reference_forward(x, params)
    assert out.shape == (BATCH, NUM_CLASSES), out.shape
    assert jnp.allclose(out, ref, atol=1e-5, rtol=1e-5), (
        float(jnp.max(jnp.abs(out - ref))))

    print("KERNEL_OK")
</pallas_src>

<mosaic_0001>
module attributes {stable_mosaic.version = 11 : i64} {
  func.func @_post_alexnet_kernel(%arg0: i32, %arg1: memref<8x1000xf32, #tpu.memory_space<vmem>>, %arg2: memref<1000x128xf32, #tpu.memory_space<vmem>>, %arg3: memref<128x128xf32, #tpu.memory_space<vmem>>, %arg4: memref<128x128xf32, #tpu.memory_space<vmem>>, %arg5: memref<8x128xf32, #tpu.memory_space<vmem>>, %arg6: memref<8x128xf32, #tpu.memory_space<vmem>>) attributes {dimension_semantics = [#tpu.dimension_semantics<parallel>], iteration_bounds = array<i64: 1>, scalar_prefetch = 0 : i64, scratch_operands = 0 : i64, tpu.core_type = #tpu.core_type<tc>, window_params = [{transform_indices = @transform_0, window_bounds = array<i64: 8, 1000>}, {pipeline_mode = #tpu.pipeline_mode<synchronous>, transform_indices = @transform_1, window_bounds = array<i64: 1000, 128>}, {pipeline_mode = #tpu.pipeline_mode<synchronous>, transform_indices = @transform_2, window_bounds = array<i64: 128, 128>}, {pipeline_mode = #tpu.pipeline_mode<synchronous>, transform_indices = @transform_3, window_bounds = array<i64: 128, 128>}, {pipeline_mode = #tpu.pipeline_mode<synchronous>, transform_indices = @transform_4, window_bounds = array<i64: 8, 128>}, {transform_indices = @transform_5, window_bounds = array<i64: 8, 128>}]} {
    %c0 = arith.constant 0 : index
    %c0_0 = arith.constant 0 : index
    %0 = vector.load %arg1[%c0, %c0_0] : memref<8x1000xf32, #tpu.memory_space<vmem>>, vector<8x1000xf32>
    %c0_1 = arith.constant 0 : index
    %c0_2 = arith.constant 0 : index
    %1 = vector.load %arg5[%c0_1, %c0_2] : memref<8x128xf32, #tpu.memory_space<vmem>>, vector<1x128xf32>
    %c1 = arith.constant 1 : index
    %c0_3 = arith.constant 0 : index
    %2 = vector.load %arg5[%c1, %c0_3] : memref<8x128xf32, #tpu.memory_space<vmem>>, vector<1x128xf32>
    %c2 = arith.constant 2 : index
    %c0_4 = arith.constant 0 : index
    %3 = vector.load %arg5[%c2, %c0_4] : memref<8x128xf32, #tpu.memory_space<vmem>>, vector<1x128xf32>
    %c0_5 = arith.constant 0 : index
    %c0_6 = arith.constant 0 : index
    %4 = vector.load %arg2[%c0_5, %c0_6] : memref<1000x128xf32, #tpu.memory_space<vmem>>, vector<1000x128xf32>
    %cst = arith.constant dense<0.000000e+00> : vector<8x128xf32>
    %5 = tpu.matmul %0, %4, %cst {dimension_numbers = #tpu.dot_dimension_numbers<[1], [0], [0], [1], [0, 0, 1, 1], [], []>} : vector<8x1000xf32>, vector<1000x128xf32>, vector<8x128xf32> -> vector<8x128xf32>
    %6 = vector.broadcast %1 : vector<1x128xf32> to vector<8x128xf32>
    %7 = arith.addf %5, %6 : vector<8x128xf32>
    %cst_7 = arith.constant 0.000000e+00 : f32
    %8 = vector.broadcast %cst_7 : f32 to vector<8x128xf32>
    %9 = arith.maximumf %7, %8 : vector<8x128xf32>
    %c0_8 = arith.constant 0 : index
    %c0_9 = arith.constant 0 : index
    %10 = vector.load %arg3[%c0_8, %c0_9] : memref<128x128xf32, #tpu.memory_space<vmem>>, vector<128x128xf32>
    %cst_10 = arith.constant dense<0.000000e+00> : vector<8x128xf32>
    %11 = tpu.matmul %9, %10, %cst_10 {dimension_numbers = #tpu.dot_dimension_numbers<[1], [0], [0], [1], [0, 0, 1, 1], [], []>} : vector<8x128xf32>, vector<128x128xf32>, vector<8x128xf32> -> vector<8x128xf32>
    %12 = vector.broadcast %2 : vector<1x128xf32> to vector<8x128xf32>
    %13 = arith.addf %11, %12 : vector<8x128xf32>
    %cst_11 = arith.constant 0.000000e+00 : f32
    %14 = vector.broadcast %cst_11 : f32 to vector<8x128xf32>
    %15 = arith.maximumf %13, %14 : vector<8x128xf32>
    %c0_12 = arith.constant 0 : index
    %c0_13 = arith.constant 0 : index
    %16 = vector.load %arg4[%c0_12, %c0_13] : memref<128x128xf32, #tpu.memory_space<vmem>>, vector<128x128xf32>
    %cst_14 = arith.constant dense<0.000000e+00> : vector<8x128xf32>
    %17 = tpu.matmul %15, %16, %cst_14 {dimension_numbers = #tpu.dot_dimension_numbers<[1], [0], [0], [1], [0, 0, 1, 1], [], []>} : vector<8x128xf32>, vector<128x128xf32>, vector<8x128xf32> -> vector<8x128xf32>
    %18 = vector.broadcast %3 : vector<1x128xf32> to vector<8x128xf32>
    %19 = arith.addf %17, %18 : vector<8x128xf32>
    %20 = arith.negf %19 : vector<8x128xf32>
    %21 = math.exp %20 : vector<8x128xf32>
    %cst_15 = arith.constant 1.000000e+00 : f32
    %22 = vector.broadcast %cst_15 : f32 to vector<8x128xf32>
    %23 = arith.addf %22, %21 : vector<8x128xf32>
    %24 = arith.divf %22, %23 : vector<8x128xf32>
    %c0_16 = arith.constant 0 : index
    %c0_17 = arith.constant 0 : index
    %25 = vector.load %arg6[%c0_16, %c0_17] : memref<8x128xf32, #tpu.memory_space<vmem>>, vector<8x128xf32>
    tpu.vector_store %arg6[%c0_16, %c0_17], %24 {strides = array<i32>} : memref<8x128xf32, #tpu.memory_space<vmem>>, vector<8x128xf32>,
    return
  }
  func.func @transform_0(%arg0: i32) -> (i32, i32) {
    %c0_i32 = arith.constant 0 : i32
    %c0_i32_0 = arith.constant 0 : i32
    return %arg0, %c0_i32 : i32, i32
  }
  func.func @transform_1(%arg0: i32) -> (i32, i32) {
    %c0_i32 = arith.constant 0 : i32
    %c0_i32_0 = arith.constant 0 : i32
    %c0_i32_1 = arith.constant 0 : i32
    return %c0_i32, %c0_i32_0 : i32, i32
  }
  func.func @transform_2(%arg0: i32) -> (i32, i32) {
    %c0_i32 = arith.constant 0 : i32
    %c0_i32_0 = arith.constant 0 : i32
    %c0_i32_1 = arith.constant 0 : i32
    return %c0_i32, %c0_i32_0 : i32, i32
  }
  func.func @transform_3(%arg0: i32) -> (i32, i32) {
    %c0_i32 = arith.constant 0 : i32
    %c0_i32_0 = arith.constant 0 : i32
    %c0_i32_1 = arith.constant 0 : i32
    return %c0_i32, %c0_i32_0 : i32, i32
  }
  func.func @transform_4(%arg0: i32) -> (i32, i32) {
    %c0_i32 = arith.constant 0 : i32
    %c0_i32_0 = arith.constant 0 : i32
    %c0_i32_1 = arith.constant 0 : i32
    return %c0_i32, %c0_i32_0 : i32, i32
  }
  func.func @transform_5(%arg0: i32) -> (i32, i32) {
    %c0_i32 = arith.constant 0 : i32
    %c0_i32_0 = arith.constant 0 : i32
    return %arg0, %c0_i32 : i32, i32
  }
}

</mosaic_0001>

<bundles_post_ra>
// kernel: post_alexnet_forward.1
= control target key start
LH: loop header
LB: loop body
LE: loop exit
PB: predicated region body
PF: predicated region fallthrough
CT: control target
= control target key end

     0   :  { %vm160_vm0 = vcmask 850944   ;;  %vm1046_vm1 = vmmov 0   ;;  %s1614_s1 = inlined_call_operand.vmem [shape: f32[1000,128], index: 1, kind: input, shape index: {}]   ;;  %s1615_s0 = inlined_call_operand.vmem [shape: f32[8,1000], index: 0, kind: input, shape index: {}]   ;;  %s1616_s2 = inlined_call_operand.vmem [shape: f32[128,128], index: 2, kind: input, shape index: {}]   ;;  %s1617_s3 = inlined_call_operand.vmem [shape: f32[128,128], index: 3, kind: input, shape index: {}]   ;;  %s1618_s4 = inlined_call_operand.vmem [shape: f32[8,128], index: 4, kind: input, shape index: {}]   ;;  %s1619_s5 = inlined_call_operand.vmem [shape: f32[8,128], index: 5, kind: output, shape index: {}]  }
   0x1   :  { %v47_v0 = vld [vmem:[%s1614_s1 + $0x80] sm:$0xff]  ;;  %v48_v1 = vld [vmem:[%s1614_s1 + $0x88] sm:$0xff]  ;;  %v49_v11 = vld [vmem:[%s1614_s1 + $0x90] sm:$0xff] }
   0x2   :  { %v79_v2 = vld [vmem:[%s1614_s1 + $0x180] sm:$0xff]  ;;  %v851_v3 = vpack.c.bf16 %v48_v1, %v47_v0  ;;  %v80_v4 = vld [vmem:[%s1614_s1 + $0x188] sm:$0xff]  ;;  %v50_v13 = vld [vmem:[%s1614_s1 + $0x98] sm:$0xff] }
   0x3   :  { %v31_v5 = vld [vmem:[%s1614_s1] sm:$0xff]  ;;  %v32_v6 = vld [vmem:[%s1614_s1 + $0x8] sm:$0xff]  ;;  %v883_v7 = vpack.c.bf16 %v80_v4, %v79_v2  ;;  %v81_v14 = vld [vmem:[%s1614_s1 + $0x190] sm:$0xff]  ;;  %v855_v16 = vpack.c.bf16 %v50_v13, %v49_v11 }
   0x4   :  { %v853_v8 = vpack.c.bf16 %v32_v6, %v31_v5  ;;  %v63_v9 = vld [vmem:[%s1614_s1 + $0x100] sm:$0xff]  ;;  %v64_v10 = vld [vmem:[%s1614_s1 + $0x108] sm:$0xff]  ;;  %852 = vmatprep.subr.bf16.mxu0 %v851_v3  ;;  %v82_v15 = vld [vmem:[%s1614_s1 + $0x198] sm:$0xff] }
   0x5   :  { %v885_v12 = vpack.c.bf16 %v64_v10, %v63_v9  ;;  %884 = vmatprep.subr.bf16.mxu1 %v883_v7  ;;  %v887_v17 = vpack.c.bf16 %v82_v15, %v81_v14  ;;  %v33_v18 = vld [vmem:[%s1614_s1 + $0x10] sm:$0xff]  ;;  %v34_v19 = vld [vmem:[%s1614_s1 + $0x18] sm:$0xff]  ;;  %v51_v23 = vld [vmem:[%s1614_s1 + $0xa0] sm:$0xff] }
   0x6   :  { %854 = vmatpush3.bf16.msra.mxu0 %v853_v8  ;;  %v65_v20 = vld [vmem:[%s1614_s1 + $0x110] sm:$0xff]  ;;  %v857_v21 = vpack.c.bf16 %v34_v19, %v33_v18  ;;  %v66_v22 = vld [vmem:[%s1614_s1 + $0x118] sm:$0xff]  ;;  %v52_v24 = vld [vmem:[%s1614_s1 + $0xa8] sm:$0xff] }
   0x7   :  { %886 = vmatpush3.bf16.msra.mxu1 %v885_v12  ;;  %856 = vmatprep.subr.bf16.mxu0 %v855_v16  ;;  %v889_v25 = vpack.c.bf16 %v66_v22, %v65_v20  ;;  %v859_v26 = vpack.c.bf16 %v52_v24, %v51_v23  ;;  %v83_v27 = vld [vmem:[%s1614_s1 + $0x1a0] sm:$0xff]  ;;  %v84_v28 = vld [vmem:[%s1614_s1 + $0x1a8] sm:$0xff]  ;;  %v53_v35 = vld [vmem:[%s1614_s1 + $0xb0] sm:$0xff] }
   0x8   :  { %888 = vmatprep.subr.bf16.mxu1 %v887_v17  ;;  %v35_v29 = vld [vmem:[%s1614_s1 + $0x20] sm:$0xff]  ;;  %v891_v30 = vpack.c.bf16 %v84_v28, %v83_v27  ;;  %v36_v31 = vld [vmem:[%s1614_s1 + $0x28] sm:$0xff]  ;;  %v54_v36 = vld [vmem:[%s1614_s1 + $0xb8] sm:$0xff] }
   0x9   :  { %v67_v32 = vld [vmem:[%s1614_s1 + $0x120] sm:$0xff]  ;;  %v68_v33 = vld [vmem:[%s1614_s1 + $0x128] sm:$0xff]  ;;  %v861_v34 = vpack.c.bf16 %v36_v31, %v35_v29  ;;  %v85_v37 = vld [vmem:[%s1614_s1 + $0x1b0] sm:$0xff]  ;;  %v863_v39 = vpack.c.bf16 %v54_v36, %v53_v35 }
   0xa   :  { %858 = vmatpush3.bf16.msra.mxu0 %v857_v21  ;;  %v893_v38 = vpack.c.bf16 %v68_v33, %v67_v32  ;;  %v86_v40 = vld [vmem:[%s1614_s1 + $0x1b8] sm:$0xff]  ;;  %v37_v41 = vld [vmem:[%s1614_s1 + $0x30] sm:$0xff]  ;;  %v55_v46 = vld [vmem:[%s1614_s1 + $0xc0] sm:$0xff] }
   0xb   :  { %890 = vmatpush3.bf16.msra.mxu1 %v889_v25  ;;  %860 = vmatprep.subr.bf16.mxu0 %v859_v26  ;;  %v38_v42 = vld [vmem:[%s1614_s1 + $0x38] sm:$0xff]  ;;  %v895_v43 = vpack.c.bf16 %v86_v40, %v85_v37  ;;  %v69_v44 = vld [vmem:[%s1614_s1 + $0x130] sm:$0xff]  ;;  %v56_v47 = vld [vmem:[%s1614_s1 + $0xc8] sm:$0xff] }
   0xc   :  { %892 = vmatprep.subr.bf16.mxu1 %v891_v30  ;;  %v70_v45 = vld [vmem:[%s1614_s1 + $0x138] sm:$0xff]  ;;  %v87_v48 = vld [vmem:[%s1614_s1 + $0x1c0] sm:$0xff]  ;;  %v88_v49 = vld [vmem:[%s1614_s1 + $0x1c8] sm:$0xff]  ;;  %v865_v50 = vpack.c.bf16 %v38_v42, %v37_v41  ;;  %v867_v52 = vpack.c.bf16 %v56_v47, %v55_v46 }
   0xd   :  { %v897_v51 = vpack.c.bf16 %v70_v45, %v69_v44  ;;  %v39_v53 = vld [vmem:[%s1614_s1 + $0x40] sm:$0xff]  ;;  %v40_v54 = vld [vmem:[%s1614_s1 + $0x48] sm:$0xff]  ;;  %v899_v56 = vpack.c.bf16 %v88_v49, %v87_v48  ;;  %v57_v58 = vld [vmem:[%s1614_s1 + $0xd0] sm:$0xff] }
   0xe   :  { %862 = vmatpush3.bf16.msra.mxu0 %v861_v34  ;;  %v71_v55 = vld [vmem:[%s1614_s1 + $0x140] sm:$0xff]  ;;  %v72_v57 = vld [vmem:[%s1614_s1 + $0x148] sm:$0xff]  ;;  %v58_v59 = vld [vmem:[%s1614_s1 + $0xd8] sm:$0xff]  ;;  %v869_v62 = vpack.c.bf16 %v40_v54, %v39_v53 }
   0xf   :  { %894 = vmatpush3.bf16.msra.mxu1 %v893_v38  ;;  %864 = vmatprep.subr.bf16.mxu0 %v863_v39  ;;  %v89_v60 = vld [vmem:[%s1614_s1 + $0x1d0] sm:$0xff]  ;;  %v90_v61 = vld [vmem:[%s1614_s1 + $0x1d8] sm:$0xff]  ;;  %v901_v63 = vpack.c.bf16 %v72_v57, %v71_v55  ;;  %v871_v0 = vpack.c.bf16 %v58_v59, %v57_v58  ;;  %v59_v6 = vld [vmem:[%s1614_s1 + $0xe0] sm:$0xff] }
  0x10   :  { %896 = vmatprep.subr.bf16.mxu1 %v895_v43  ;;  %v41_v1 = vld [vmem:[%s1614_s1 + $0x50] sm:$0xff]  ;;  %v42_v2 = vld [vmem:[%s1614_s1 + $0x58] sm:$0xff]  ;;  %v903_v4 = vpack.c.bf16 %v90_v61, %v89_v60  ;;  %v60_v7 = vld [vmem:[%s1614_s1 + $0xe8] sm:$0xff] }
  0x11   :  { %v73_v3 = vld [vmem:[%s1614_s1 + $0x150] sm:$0xff]  ;;  %v74_v5 = vld [vmem:[%s1614_s1 + $0x158] sm:$0xff]  ;;  %v91_v8 = vld [vmem:[%s1614_s1 + $0x1e0] sm:$0xff]  ;;  %v873_v10 = vpack.c.bf16 %v42_v2, %v41_v1  ;;  %v875_v14 = vpack.c.bf16 %v60_v7, %v59_v6 }
  0x12   :  { %866 = vmatpush3.bf16.msra.mxu0 %v865_v50  ;;  %v92_v9 = vld [vmem:[%s1614_s1 + $0x1e8] sm:$0xff]  ;;  %v43_v11 = vld [vmem:[%s1614_s1 + $0x60] sm:$0xff]  ;;  %v905_v13 = vpack.c.bf16 %v74_v5, %v73_v3  ;;  %v23_v17 = vld [vmem:[%s1615_s0 + $0x18] sm:$0xff] }
  0x13   :  { %898 = vmatpush3.bf16.msra.mxu1 %v897_v51  ;;  %868 = vmatprep.subr.bf16.mxu0 %v867_v52  ;;  %v44_v12 = vld [vmem:[%s1614_s1 + $0x68] sm:$0xff]  ;;  %v75_v15 = vld [vmem:[%s1614_s1 + $0x160] sm:$0xff]  ;;  %v907_v18 = vpack.c.bf16 %v92_v9, %v91_v8  ;;  %v61_v20 = vld [vmem:[%s1614_s1 + $0xf0] sm:$0xff]  ;;  %v1044_v51 = vmov 0.0|0.0  }
  0x14   :  { %900 = vmatprep.subr.bf16.mxu1 %v899_v56  ;;  %v21_v16 = vld [vmem:[%s1615_s0 + $0x8] sm:$0xff]  ;;  %v62_v21 = vld [vmem:[%s1614_s1 + $0xf8] sm:$0xff]  ;;  %v93_v22 = vld [vmem:[%s1614_s1 + $0x1f0] sm:$0xff]  ;;  %298 = vmatprep.mubr.f32.mxu1 %v23_v17  ;;  %v877_v24 = vpack.c.bf16 %v44_v12, %v43_v11 }
  0x15   :  { %v76_v19 = vld [vmem:[%s1614_s1 + $0x168] sm:$0xff]  ;;  %228 = vmatprep.mubr.f32.mxu0 %v21_v16  ;;  %v94_v23 = vld [vmem:[%s1614_s1 + $0x1f8] sm:$0xff]  ;;  %v879_v26 = vpack.c.bf16 %v62_v21, %v61_v20  ;;  %v45_v27 = vld [vmem:[%s1614_s1 + $0x70] sm:$0xff] }
  0x16   :  { %870 = vmatpush3.bf16.msra.mxu0 %v869_v62  ;;  %v909_v25 = vpack.c.bf16 %v76_v19, %v75_v15  ;;  %v46_v28 = vld [vmem:[%s1614_s1 + $0x78] sm:$0xff]  ;;  %v77_v29 = vld [vmem:[%s1614_s1 + $0x170] sm:$0xff]  ;;  %v911_v30 = vpack.c.bf16 %v94_v23, %v93_v22  ;;  %v111_v32 = vld [vmem:[%s1614_s1 + $0x280] sm:$0xff] }
  0x17   :  { %902 = vmatpush3.bf16.msra.mxu1 %v901_v63  ;;  %872 = vmatprep.subr.bf16.mxu0 %v871_v0  ;;  %v78_v31 = vld [vmem:[%s1614_s1 + $0x178] sm:$0xff]  ;;  %v112_v33 = vld [vmem:[%s1614_s1 + $0x288] sm:$0xff]  ;;  %v881_v34 = vpack.c.bf16 %v46_v28, %v45_v27  ;;  %v95_v37 = vld [vmem:[%s1614_s1 + $0x200] sm:$0xff] }
  0x18   :  { %904 = vmatprep.subr.bf16.mxu1 %v903_v4  ;;  %v913_v35 = vpack.c.bf16 %v78_v31, %v77_v29  ;;  %v915_v36 = vpack.c.bf16 %v112_v33, %v111_v32  ;;  %v96_v38 = vld [vmem:[%s1614_s1 + $0x208] sm:$0xff]  ;;  %v127_v39 = vld [vmem:[%s1614_s1 + $0x300] sm:$0xff]  ;;  %v113_v41 = vld [vmem:[%s1614_s1 + $0x290] sm:$0xff] }
  0x19   :  { %v128_v40 = vld [vmem:[%s1614_s1 + $0x308] sm:$0xff]  ;;  %v114_v42 = vld [vmem:[%s1614_s1 + $0x298] sm:$0xff]  ;;  %v20_v43 = vld [vmem:[%s1615_s0] sm:$0xff]  ;;  %v917_v45 = vpack.c.bf16 %v96_v38, %v95_v37 }
  0x1a   :  { %874 = vmatpush3.bf16.msra.mxu0 %v873_v10  ;;  %v22_v44 = vld [vmem:[%s1615_s0 + $0x10] sm:$0xff]  ;;  %v948_v46 = vpack.c.bf16 %v128_v40, %v127_v39  ;;  %v919_v47 = vpack.c.bf16 %v114_v42, %v113_v41  ;;  %v98_v49 = vld [vmem:[%s1614_s1 + $0x218] sm:$0xff]  ;;  %v115_v53 = vld [vmem:[%s1614_s1 + $0x2a0] sm:$0xff] }
  0x1b   :  { %906 = vmatpush3.bf16.msra.mxu1 %v905_v13  ;;  %876 = vmatprep.subr.bf16.mxu0 %v875_v14  ;;  %v97_v48 = vld [vmem:[%s1614_s1 + $0x210] sm:$0xff]  ;;  %v130_v52 = vld [vmem:[%s1614_s1 + $0x318] sm:$0xff]  ;;  %v116_v54 = vld [vmem:[%s1614_s1 + $0x2a8] sm:$0xff] }
  0x1c   :  { %908 = vmatprep.subr.bf16.mxu1 %v907_v18  ;;  %v129_v50 = vld [vmem:[%s1614_s1 + $0x310] sm:$0xff]  ;;  %v921_v55 = vpack.c.bf16 %v98_v49, %v97_v48  ;;  %v99_v56 = vld [vmem:[%s1614_s1 + $0x220] sm:$0xff]  ;;  %v923_v58 = vpack.c.bf16 %v116_v54, %v115_v53  ;;  %v100_v59 = vld [vmem:[%s1614_s1 + $0x228] sm:$0xff] }
  0x1d   :  { %v951_v57 = vpack.c.bf16 %v130_v52, %v129_v50  ;;  %v131_v60 = vld [vmem:[%s1614_s1 + $0x320] sm:$0xff]  ;;  %v132_v61 = vld [vmem:[%s1614_s1 + $0x328] sm:$0xff]  ;;  %v117_v62 = vld [vmem:[%s1614_s1 + $0x2b0] sm:$0xff]  ;;  %v925_v1 = vpack.c.bf16 %v100_v59, %v99_v56 }
  0x1e   :  { %878 = vmatpush3.bf16.msra.mxu0 %v877_v24  ;;  %v118_v63 = vld [vmem:[%s1614_s1 + $0x2b8] sm:$0xff]  ;;  %v25_v0 = vld [vmem:[%s1615_s0 + $0x28] sm:$0xff]  ;;  %v954_v2 = vpack.c.bf16 %v132_v61, %v131_v60  ;;  %v101_v4 = vld [vmem:[%s1614_s1 + $0x230] sm:$0xff] }
  0x1f   :  { %910 = vmatpush3.bf16.msra.mxu1 %v909_v25  ;;  %880 = vmatprep.subr.bf16.mxu0 %v879_v26  ;;  %v927_v3 = vpack.c.bf16 %v118_v63, %v117_v62  ;;  %v102_v5 = vld [vmem:[%s1614_s1 + $0x238] sm:$0xff]  ;;  %v133_v6 = vld [vmem:[%s1614_s1 + $0x330] sm:$0xff]  ;;  %v119_v8 = vld [vmem:[%s1614_s1 + $0x2c0] sm:$0xff] }
  0x20   :  { %912 = vmatprep.subr.bf16.mxu1 %v911_v30  ;;  %v134_v7 = vld [vmem:[%s1614_s1 + $0x338] sm:$0xff]  ;;  %v120_v9 = vld [vmem:[%s1614_s1 + $0x2c8] sm:$0xff]  ;;  %v929_v11 = vpack.c.bf16 %v102_v5, %v101_v4  ;;  %v103_v14 = vld [vmem:[%s1614_s1 + $0x240] sm:$0xff] }
  0x21   :  { %v27_v10 = vld [vmem:[%s1615_s0 + $0x38] sm:$0xff]  ;;  %v957_v12 = vpack.c.bf16 %v134_v7, %v133_v6  ;;  %v931_v13 = vpack.c.bf16 %v120_v9, %v119_v8  ;;  %v104_v15 = vld [vmem:[%s1614_s1 + $0x248] sm:$0xff]  ;;  %v135_v16 = vld [vmem:[%s1614_s1 + $0x340] sm:$0xff] }
  0x22   :  { %882 = vmatpush3.bf16.msra.mxu0 %v881_v34  ;;  %v136_v17 = vld [vmem:[%s1614_s1 + $0x348] sm:$0xff]  ;;  %v121_v18 = vld [vmem:[%s1614_s1 + $0x2d0] sm:$0xff]  ;;  %v122_v19 = vld [vmem:[%s1614_s1 + $0x2d8] sm:$0xff]  ;;  %v933_v20 = vpack.c.bf16 %v104_v15, %v103_v14 }
  0x23   :  { %914 = vmatpush3.bf16.msra.mxu1 %v913_v35  ;;  %916 = vmatprep.subr.bf16.mxu0 %v915_v36  ;;  %v960_v21 = vpack.c.bf16 %v136_v17, %v135_v16  ;;  %v935_v22 = vpack.c.bf16 %v122_v19, %v121_v18  ;;  %v105_v23 = vld [vmem:[%s1614_s1 + $0x250] sm:$0xff]  ;;  %v106_v24 = vld [vmem:[%s1614_s1 + $0x258] sm:$0xff]  ;;  %v123_v27 = vld [vmem:[%s1614_s1 + $0x2e0] sm:$0xff] }
  0x24   :  { %947 = vmatprep.subr.bf16.mxu1 %v1044_v51  ;;  %v137_v25 = vld [vmem:[%s1614_s1 + $0x350] sm:$0xff]  ;;  %v138_v26 = vld [vmem:[%s1614_s1 + $0x358] sm:$0xff]  ;;  %v124_v28 = vld [vmem:[%s1614_s1 + $0x2e8] sm:$0xff]  ;;  %v937_v29 = vpack.c.bf16 %v106_v24, %v105_v23 }
  0x25   :  { %229 = vmatmul.mubr.f32.vlgmr.msra.gmra.mrb[0].mxu0 %v20_v43  ;;  %v963_v30 = vpack.c.bf16 %v138_v26, %v137_v25  ;;  %v939_v31 = vpack.c.bf16 %v124_v28, %v123_v27  ;;  %v107_v32 = vld [vmem:[%s1614_s1 + $0x260] sm:$0xff]  ;;  %v108_v33 = vld [vmem:[%s1614_s1 + $0x268] sm:$0xff]  ;;  %v125_v36 = vld [vmem:[%s1614_s1 + $0x2f0] sm:$0xff] }
  0x26   :  { %299 = vmatmul.mubr.f32.vlgmr.msra.gmra.mrb[0].mxu1 %v22_v44  ;;  %918 = vmatpush3.bf16.msra.mxu0 %v917_v45  ;;  %v139_v34 = vld [vmem:[%s1614_s1 + $0x360] sm:$0xff]  ;;  %v140_v35 = vld [vmem:[%s1614_s1 + $0x368] sm:$0xff]  ;;  %v126_v37 = vld [vmem:[%s1614_s1 + $0x2f8] sm:$0xff]  ;;  %v941_v38 = vpack.c.bf16 %v108_v33, %v107_v32 }
  0x27   :  { %949 = vmatpush1.bf16.msra.mxu1 %v948_v46  ;;  %920 = vmatprep.subr.bf16.mxu0 %v919_v47  ;;  %v966_v39 = vpack.c.bf16 %v140_v35, %v139_v34  ;;  %v943_v40 = vpack.c.bf16 %v126_v37, %v125_v36  ;;  %v109_v41 = vld [vmem:[%s1614_s1 + $0x270] sm:$0xff]  ;;  %v110_v42 = vld [vmem:[%s1614_s1 + $0x278] sm:$0xff]  ;;  %v143_v47 = vld [vmem:[%s1614_s1 + $0x380] sm:$0xff] }
  0x28   :  { %950 = vmatprep.subr.bf16.mxu1 %v1044_v51  ;;  %368 = vmatprep.mubr.f32.mxu0 %v25_v0  ;;  %v141_v43 = vld [vmem:[%s1614_s1 + $0x370] sm:$0xff]  ;;  %v142_v44 = vld [vmem:[%s1614_s1 + $0x378] sm:$0xff]  ;;  %v945_v45 = vpack.c.bf16 %v110_v42, %v109_v41  ;;  %v144_v48 = vld [vmem:[%s1614_s1 + $0x388] sm:$0xff] }
  0x29   :  { %638 = vmatprep.mubr.msk.f32.mxu1 %vm160_vm0, %v27_v10  ;;  %v969_v46 = vpack.c.bf16 %v142_v44, %v141_v43  ;;  %v24_v49 = vld [vmem:[%s1615_s0 + $0x20] sm:$0xff]  ;;  %v972_v50 = vpack.c.bf16 %v144_v48, %v143_v47  ;;  %v145_v52 = vld [vmem:[%s1614_s1 + $0x390] sm:$0xff]  ;;  %v146_v53 = vld [vmem:[%s1614_s1 + $0x398] sm:$0xff] }
  0x2a   :  { %922 = vmatpush3.bf16.msra.mxu0 %v921_v55  ;;  %v975_v54 = vpack.c.bf16 %v146_v53, %v145_v52  ;;  %v147_v55 = vld [vmem:[%s1614_s1 + $0x3a0] sm:$0xff]  ;;  %v148_v56 = vld [vmem:[%s1614_s1 + $0x3a8] sm:$0xff]  ;;  %v150_v59 = vld [vmem:[%s1614_s1 + $0x3b8] sm:$0xff] }
  0x2b   :  { %952 = vmatpush1.bf16.msra.mxu1 %v951_v57  ;;  %924 = vmatprep.subr.bf16.mxu0 %v923_v58  ;;  %v978_v57 = vpack.c.bf16 %v148_v56, %v147_v55  ;;  %v149_v58 = vld [vmem:[%s1614_s1 + $0x3b0] sm:$0xff]  ;;  %v151_v61 = vld [vmem:[%s1614_s1 + $0x3c0] sm:$0xff]  ;;  %v152_v62 = vld [vmem:[%s1614_s1 + $0x3c8] sm:$0xff] }
  0x2c   :  { %953 = vmatprep.subr.bf16.mxu1 %v1044_v51  ;;  %v981_v60 = vpack.c.bf16 %v150_v59, %v149_v58  ;;  %v984_v63 = vpack.c.bf16 %v152_v62, %v151_v61  ;;  %v153_v0 = vld [vmem:[%s1614_s1 + $0x3d0] sm:$0xff]  ;;  %v155_v4 = vld [vmem:[%s1614_s1 + $0x3e0] sm:$0xff]  ;;  %v446_v7 = vld [vmem:[%s1616_s2 + $0x8] sm:$0xff] }
  0x2d   :  { %v26_v5 = vld [vmem:[%s1615_s0 + $0x30] sm:$0xff]  ;;  %v445_v6 = vld [vmem:[%s1616_s2] sm:$0xff]  ;;  %v448_v10 = vld [vmem:[%s1616_s2 + $0x18] sm:$0xff] }
  0x2e   :  { %926 = vmatpush3.bf16.msra.mxu0 %v925_v1  ;;  %v154_v1 = vld [vmem:[%s1614_s1 + $0x3d8] sm:$0xff]  ;;  %v990_v8 = vpack.c.bf16 %v446_v7, %v445_v6  ;;  %v447_v9 = vld [vmem:[%s1616_s2 + $0x10] sm:$0xff]  ;;  %v453_v18 = vld [vmem:[%s1616_s2 + $0x40] sm:$0xff] }
  0x2f   :  { %955 = vmatpush1.bf16.msra.mxu1 %v954_v2  ;;  %928 = vmatprep.subr.bf16.mxu0 %v927_v3  ;;  %v987_v2 = vpack.c.bf16 %v154_v1, %v153_v0  ;;  %v1045_v3 = vmov 0.0   ;;  %v451_v15 = vld [vmem:[%s1616_s2 + $0x30] sm:$0xff]  ;;  %v452_v16 = vld [vmem:[%s1616_s2 + $0x38] sm:$0xff]  ;;  %v454_v19 = vld [vmem:[%s1616_s2 + $0x48] sm:$0xff] }
  0x30   :  { %956 = vmatprep.subr.bf16.mxu1 %v1044_v51  ;;  %v999_v17 = vpack.c.bf16 %v452_v16, %v451_v15  ;;  %v457_v24 = vld [vmem:[%s1616_s2 + $0x60] sm:$0xff]  ;;  %v458_v25 = vld [vmem:[%s1616_s2 + $0x68] sm:$0xff]  ;;  %v459_v27 = vld [vmem:[%s1616_s2 + $0x70] sm:$0xff] }
  0x31   :  { %v1008_v26 = vpack.c.bf16 %v458_v25, %v457_v24  ;;  %v460_v28 = vld [vmem:[%s1616_s2 + $0x78] sm:$0xff]  ;;  %v538_v32 = vld [vmem:[%s1617_s3 + $0x10] sm:$0xff]  ;;  %v540_v36 = vld [vmem:[%s1617_s3 + $0x20] sm:$0xff] }
  0x32   :  { %930 = vmatpush3.bf16.msra.mxu0 %v929_v11  ;;  %v449_v11 = vld [vmem:[%s1616_s2 + $0x20] sm:$0xff]  ;;  %v539_v34 = vld [vmem:[%s1617_s3 + $0x18] sm:$0xff]  ;;  %v541_v37 = vld [vmem:[%s1617_s3 + $0x28] sm:$0xff] }
  0x33   :  { %958 = vmatpush1.bf16.msra.mxu1 %v957_v12  ;;  %932 = vmatprep.subr.bf16.mxu0 %v931_v13  ;;  %v993_v12 = vpack.c.bf16 %v448_v10, %v447_v9  ;;  %v450_v13 = vld [vmem:[%s1616_s2 + $0x28] sm:$0xff]  ;;  %v1017_v35 = vpack.c.bf16 %v539_v34, %v538_v32  ;;  %v544_v42 = vld [vmem:[%s1617_s3 + $0x40] sm:$0xff] }
  0x34   :  { %959 = vmatprep.subr.bf16.mxu1 %v1044_v51  ;;  %v996_v14 = vpack.c.bf16 %v450_v13, %v449_v11  ;;  %v545_v43 = vld [vmem:[%s1617_s3 + $0x48] sm:$0xff]  ;;  %v548_v48 = vld [vmem:[%s1617_s3 + $0x60] sm:$0xff] }
  0x35   :  { %v1026_v44 = vpack.c.bf16 %v545_v43, %v544_v42  ;;  %v639_v7 = vld [vmem:[%s1618_s4 + $0x1] ss:$0 sm:$0xff] }
  0x36   :  { %934 = vmatpush3.bf16.msra.mxu0 %v933_v20  ;;  %v1002_v20 = vpack.c.bf16 %v454_v19, %v453_v18 }
  0x37   :  { %961 = vmatpush1.bf16.msra.mxu1 %v960_v21  ;;  %936 = vmatprep.subr.bf16.mxu0 %v935_v22  ;;  %v455_v21 = vld [vmem:[%s1616_s2 + $0x50] sm:$0xff]  ;;  %v456_v22 = vld [vmem:[%s1616_s2 + $0x58] sm:$0xff] }
  0x38   :  { %962 = vmatprep.subr.bf16.mxu1 %v1044_v51  ;;  %v1005_v23 = vpack.c.bf16 %v456_v22, %v455_v21 }
  0x3a   :  { %938 = vmatpush3.bf16.msra.mxu0 %v937_v29  ;;  %v1011_v29 = vpack.c.bf16 %v460_v28, %v459_v27 }
  0x3b   :  { %964 = vmatpush1.bf16.msra.mxu1 %v963_v30  ;;  %940 = vmatprep.subr.bf16.mxu0 %v939_v31  ;;  %v536_v30 = vld [vmem:[%s1617_s3] sm:$0xff]  ;;  %v537_v31 = vld [vmem:[%s1617_s3 + $0x8] sm:$0xff] }
  0x3c   :  { %965 = vmatprep.subr.bf16.mxu1 %v1044_v51  ;;  %v1014_v33 = vpack.c.bf16 %v537_v31, %v536_v30 }
  0x3e   :  { %942 = vmatpush3.bf16.msra.mxu0 %v941_v38  ;;  %v1020_v38 = vpack.c.bf16 %v541_v37, %v540_v36 }
  0x3f   :  { %967 = vmatpush1.bf16.msra.mxu1 %v966_v39  ;;  %944 = vmatprep.subr.bf16.mxu0 %v943_v40  ;;  %v542_v39 = vld [vmem:[%s1617_s3 + $0x30] sm:$0xff]  ;;  %v543_v40 = vld [vmem:[%s1617_s3 + $0x38] sm:$0xff] }
  0x40   :  { %968 = vmatprep.subr.bf16.mxu1 %v1044_v51  ;;  %v1023_v41 = vpack.c.bf16 %v543_v40, %v542_v39 }
  0x42   :  { %946 = vmatpush3.bf16.msra.mxu0 %v945_v45  ;;  %v546_v45 = vld [vmem:[%s1617_s3 + $0x50] sm:$0xff] }
  0x43   :  { %970 = vmatpush1.bf16.msra.mxu1 %v969_v46  ;;  %989 = vmatprep.subr.bf16.mxu0 %v1044_v51  ;;  %v547_v46 = vld [vmem:[%s1617_s3 + $0x58] sm:$0xff] }
  0x44   :  { %971 = vmatprep.subr.bf16.mxu1 %v1044_v51  ;;  %v1029_v47 = vpack.c.bf16 %v547_v46, %v546_v45 }
  0x45   :  { %369 = vmatmul.mubr.f32.vlgmr.msra.gmra.mrb[2].mxu0 %v24_v49  ;;  %v549_v49 = vld [vmem:[%s1617_s3 + $0x68] sm:$0xff] }
  0x46   :  { %991 = vmatpush3.bf16.msra.mxu0 %v990_v8  ;;  %813 = vmatprep.mubr.msk.f32.mxu0 %vm1046_vm1, %v1045_v3 }
  0x47   :  { %973 = vmatpush1.bf16.msra.mxu1 %v972_v50  ;;  %992 = vmatprep.subr.bf16.mxu0 %v1044_v51  ;;  %v1032_v50 = vpack.c.bf16 %v549_v49, %v548_v48 }
  0x48   :  { %974 = vmatprep.subr.bf16.mxu1 %v1044_v51 }
  0x4a   :  { %994 = vmatpush3.bf16.msra.mxu0 %v993_v12  ;;  %v640_v12 = vld [vmem:[%s1618_s4 + $0x2] ss:$0 sm:$0xff] }
  0x4b   :  { %976 = vmatpush1.bf16.msra.mxu1 %v975_v54  ;;  %995 = vmatprep.subr.bf16.mxu0 %v1044_v51  ;;  %v637_v54 = vld [vmem:[%s1618_s4] ss:$0 sm:$0xff] }
  0x4c   :  { %977 = vmatprep.subr.bf16.mxu1 %v1044_v51 }
  0x4e   :  { %997 = vmatpush3.bf16.msra.mxu0 %v996_v14 }
  0x4f   :  { %979 = vmatpush1.bf16.msra.mxu1 %v978_v57  ;;  %998 = vmatprep.subr.bf16.mxu0 %v1044_v51 }
  0x50   :  { %980 = vmatprep.subr.bf16.mxu1 %v1044_v51 }
  0x52   :  { %1000 = vmatpush3.bf16.msra.mxu0 %v999_v17 }
  0x53   :  { %982 = vmatpush1.bf16.msra.mxu1 %v981_v60  ;;  %1001 = vmatprep.subr.bf16.mxu0 %v1044_v51 }
  0x54   :  { %983 = vmatprep.subr.bf16.mxu1 %v1044_v51 }
  0x56   :  { %1003 = vmatpush3.bf16.msra.mxu0 %v1002_v20 }
  0x57   :  { %985 = vmatpush1.bf16.msra.mxu1 %v984_v63  ;;  %1004 = vmatprep.subr.bf16.mxu0 %v1044_v51 }
  0x58   :  { %986 = vmatprep.subr.bf16.mxu1 %v1044_v51 }
  0x5a   :  { %1006 = vmatpush3.bf16.msra.mxu0 %v1005_v23 }
  0x5b   :  { %988 = vmatpush1.bf16.msra.mxu1 %v987_v2  ;;  %1007 = vmatprep.subr.bf16.mxu0 %v1044_v51 }
  0x5c   :  { %430 = vmatprep.subr.mxu1 %v1045_v3 }
  0x5e   :  { %1009 = vmatpush3.bf16.msra.mxu0 %v1008_v26 }
  0x5f   :  { %431 = vmatpush1.msra.mxu1 %v155_v4  ;;  %1010 = vmatprep.subr.bf16.mxu0 %v1044_v51  ;;  %v550_v4 = vld [vmem:[%s1617_s3 + $0x70] sm:$0xff] }
  0x60   :  { %439 = vmatmul.mubr.f32.vlgmr.msra.gmra.mrb[2].mxu1 %v26_v5  ;;  %1013 = vmatprep.subr.bf16.mxu1 %v1044_v51  ;;  %v551_v5 = vld [vmem:[%s1617_s3 + $0x78] sm:$0xff] }
  0x61   :  { %848 = vmatprep.mubr.msk.f32.mxu1 %vm1046_vm1, %v1045_v3  ;;  %1015 = vmatpush3.bf16.msra.mxu1 %v1014_v33  ;;  %v1035_v6 = vpack.c.bf16 %v551_v5, %v550_v4 }
  0x62   :  { %1012 = vmatpush3.bf16.msra.mxu0 %v1011_v29  ;;  %1016 = vmatprep.subr.bf16.mxu1 %v1044_v51 }
  0x65   :  { %1018 = vmatpush3.bf16.msra.mxu1 %v1017_v35 }
  0x66   :  { %1019 = vmatprep.subr.bf16.mxu1 %v1044_v51 }
  0x69   :  { %1021 = vmatpush3.bf16.msra.mxu1 %v1020_v38 }
  0x6a   :  { %1022 = vmatprep.subr.bf16.mxu1 %v1044_v51 }
  0x6d   :  { %1024 = vmatpush3.bf16.msra.mxu1 %v1023_v41 }
  0x6e   :  { %1025 = vmatprep.subr.bf16.mxu1 %v1044_v51 }
  0x71   :  { %1027 = vmatpush3.bf16.msra.mxu1 %v1026_v44 }
  0x72   :  { %1028 = vmatprep.subr.bf16.mxu1 %v1044_v51 }
  0x75   :  { %1030 = vmatpush3.bf16.msra.mxu1 %v1029_v47 }
  0x76   :  { %1031 = vmatprep.subr.bf16.mxu1 %v1044_v51 }
  0x79   :  { %1033 = vmatpush3.bf16.msra.mxu1 %v1032_v50 }
  0x7a   :  { %1034 = vmatprep.subr.bf16.mxu1 %v1044_v51 }
  0x7d   :  { %1036 = vmatpush3.bf16.msra.mxu1 %v1035_v6 }
  0xf8   :  { %v674_v52 = vpop.f32.mrb[0].mxu0 }
  0xf9   :  { %v709_v53 = vpop.f32.mrb[0].mxu1  ;;  %v675_v55 = vpop.f32.mrb[1].mxu0 }
  0xfa   :  { %v676_v56 = vadd.f32 %v675_v55, %v674_v52  ;;  %v710_v57 = vpop.f32.mrb[1].mxu1 }
  0xfb   :  { %v711_v58 = vadd.f32 %v710_v57, %v709_v53 }
  0xfc   :  { %v231_v59 = vadd.f32 %v676_v56, %v637_v54 }
  0xfe   :  { %v301_v60 = vadd.f32 %v711_v58, %v231_v59 }
 0x118   :  { %v744_v61 = vpop.f32.mrb[2].mxu0 }
 0x119   :  { %v745_v62 = vpop.f32.mrb[3].mxu0 }
 0x11a   :  { %v746_v63 = vadd.f32 %v745_v62, %v744_v61 }
 0x11c   :  { %v371_v0 = vadd.f32 %v746_v63, %v301_v60 }
 0x133   :  { %v440_v1 = vpop.f32.mrb[2].mxu1 }
 0x134   :  { %v441_v2 = vadd.f32 %v440_v1, %v371_v0  ;;  %v442_v3 = vpop.f32.mrb[3].mxu1 }
 0x136   :  { %v444_v51 = vmax.f32 %v441_v2, 0.0 }
 0x138   :  { %814 = vmatmul.mubr.f32.vlgmr.msra.gmra.mrb[4].mxu0 %v444_v51 }
 0x20b   :  { %v531_v8 = vpop.f32.mrb[4].mxu0 }
 0x20c   :  { %v532_v9 = vadd.f32 %v639_v7, %v531_v8  ;;  %v815_v10 = vpop.f32.mrb[5].mxu0 }
 0x20e   :  { %v535_v11 = vmax.f32 %v532_v9, 0.0 }
 0x210   :  { %849 = vmatmul.mubr.f32.vlgmr.msra.gmra.mrb[4].mxu1 %v535_v11 }
 0x2e3   :  { %v622_v13 = vpop.f32.mrb[4].mxu1 }
 0x2e4   :  { %v623_v14 = vadd.f32 %v640_v12, %v622_v13  ;;  %v850_v15 = vpop.f32.mrb[5].mxu1 }
 0x2e6   :  { %v641_v16 = vmul.f32 -1.442695, %v623_v14 }
 0x2e8   :  { %1040 = vpow2.f32 %v641_v16 }
 0x2f2   :  { %v1041_v17 = vpop.eup %1040 }
 0x2f3   :  { %v629_v18 = vadd.f32 1.0, %v1041_v17 }
 0x2f5   :  { %1042 = vrcp.f32 %v629_v18 }
 0x2ff   :  { %v1043_v19 = vpop.eup %1042 }
 0x300   :  { %632 = vst [vmem:[%s1619_s5] sm:$0xff] %v1043_v19 }

</bundles_post_ra>
